<compile_context>
chip_gen: v7x
topology: tpu7x:2x2x1
jax: 0.10.0
libtpu: 0.0.40
codegen_flags: <defaults>
</compile_context>

<pallas_src>
import jax
import jax.numpy as jnp
from jax.experimental import pallas as pl
from jax.experimental.pallas import tpu as pltpu


def _round_up(a: int, b: int) -> int:
    return ((a + b - 1) // b) * b


# ----------------------------- Pallas kernel -----------------------------------
def conv_bn_relu_kernel(p_ref, w_ref, shift_ref, o_ref):
    # p_ref:     (TM, Kdim)        bf16 im2col patches tile
    # w_ref:     (Kdim, Cout_pad)  bf16 conv weight with BN scale folded in
    # shift_ref: (1, Cout_pad)     f32  beta - running_mean * scale (zero in padding)
    # o_ref:     (TM, Cout_pad)    f32
    y = jnp.dot(p_ref[...], w_ref[...], preferred_element_type=jnp.float32)  # MXU bf16, f32 acc
    y = y + shift_ref[...]                                                    # fused BN shift (eval)
    o_ref[...] = jnp.maximum(y, 0.0).astype(o_ref.dtype)                      # ReLU


def _conv_bn_relu_matmul(patches, w_mat, shift, *, tm):
    M_pad, Kdim = patches.shape
    Cout_pad = w_mat.shape[1]
    grid = (M_pad // tm,)

    # VMEM budget: double-buffered patches + weight + output tiles (+ shift), 1.5x slack.
    vmem_bytes = (2 * tm * Kdim * 2           # patches tiles (bf16)
                  + 2 * Kdim * Cout_pad * 2   # weight tiles (bf16)
                  + 2 * tm * Cout_pad * 4     # output tiles (f32)
                  + 2 * Cout_pad * 4)         # shift (f32)
    vmem_limit = int(min(64 * 2**20, max(32 * 2**20, vmem_bytes * 3 // 2)))

    cost = pl.CostEstimate(
        flops=2 * M_pad * Kdim * Cout_pad,
        transcendentals=0,
        bytes_accessed=(M_pad * Kdim * 2 + Kdim * Cout_pad * 2
                        + Cout_pad * 4 + M_pad * Cout_pad * 4),
    )

    return pl.pallas_call(
        conv_bn_relu_kernel,
        out_shape=jax.ShapeDtypeStruct((M_pad, Cout_pad), jnp.float32),
        grid_spec=pltpu.PrefetchScalarGridSpec(
            num_scalar_prefetch=0,
            grid=grid,
            in_specs=[
                pl.BlockSpec((tm, Kdim), lambda i: (i, 0)),
                pl.BlockSpec((Kdim, Cout_pad), lambda i: (0, 0)),
                pl.BlockSpec((1, Cout_pad), lambda i: (0, 0)),
            ],
            out_specs=pl.BlockSpec((tm, Cout_pad), lambda i: (i, 0)),
        ),
        compiler_params=pltpu.CompilerParams(
            dimension_semantics=("parallel",),
            vmem_limit_bytes=vmem_limit,
        ),
        cost_estimate=cost,
    )(patches, w_mat, shift)


# ------------------------------- JAX glue ---------------------------------------
def im2col_nchw(x, kh, kw, pad, dtype=jnp.bfloat16):
    """x: (N, Cin, H, W) -> patches (N*H*W, Cin*KH*KW) in bf16, 'same' conv, stride 1."""
    N, Cin, H, W = x.shape
    xp = jnp.pad(x.astype(dtype), ((0, 0), (0, 0), (pad, pad), (pad, pad)))
    taps = [xp[:, :, i:i + H, j:j + W] for i in range(kh) for j in range(kw)]
    p = jnp.stack(taps, axis=0)                 # (KH*KW, N, Cin, H, W)
    p = jnp.transpose(p, (1, 3, 4, 2, 0))       # (N, H, W, Cin, KH*KW)
    return p.reshape(N * H * W, Cin * kh * kw)


def basic_conv2d_forward(x, conv_w, gamma, beta, running_mean, running_var,
                         *, eps=1e-3, padding=1, tm=512):
    """x: (N, Cin, H, W) NCHW; conv_w: (Cout, Cin, KH, KW).  Returns (N, Cout, H, W)."""
    N, Cin, H, W = x.shape
    Cout, _, KH, KW = conv_w.shape
    Kdim = Cin * KH * KW
    M = N * H * W

    # One-time parameter prep: fold eval-mode BN scale into the weight columns.
    scale = gamma.astype(jnp.float32) / jnp.sqrt(running_var.astype(jnp.float32) + eps)  # (Cout,)
    shift = beta.astype(jnp.float32) - running_mean.astype(jnp.float32) * scale          # (Cout,)
    w_mat = conv_w.astype(jnp.float32).reshape(Cout, Kdim).T * scale[None, :]            # (Kdim, Cout)

    # Lane-dense output: pad Cout to a multiple of 128 with zero columns / zero shift.
    Cout_pad = _round_up(Cout, 128)
    w_mat = jnp.pad(w_mat, ((0, 0), (0, Cout_pad - Cout))).astype(jnp.bfloat16)
    shift = jnp.pad(shift, (0, Cout_pad - Cout)).reshape(1, Cout_pad)                    # f32

    # im2col patches in bf16 (halves HBM bytes vs the previous f32 im2col).
    patches = im2col_nchw(x, KH, KW, padding)                                            # (M, Kdim)

    # Row tiling: tm a multiple of 8, capped so the grid has >= 2 parallel steps.
    tm = max(8, min(tm, _round_up(pl.cdiv(M, 2), 8)))
    M_pad = _round_up(M, tm)
    if M_pad != M:
        patches = jnp.pad(patches, ((0, M_pad - M), (0, 0)))

    y = _conv_bn_relu_matmul(patches, w_mat, shift, tm=tm)    # (M_pad, Cout_pad) f32
    y = y[:M, :Cout].reshape(N, H, W, Cout)
    # TODO(synk): keep NHWC in real pipelines; NCHW restored here to match the module API.
    return jnp.transpose(y, (0, 3, 1, 2))


# ------------------------------ reference ---------------------------------------
def reference_forward(x, conv_w, gamma, beta, running_mean, running_var, *, eps=1e-3, padding=1):
    y = jax.lax.conv_general_dilated(
        x.astype(jnp.float32), conv_w.astype(jnp.float32),
        window_strides=(1, 1), padding=((padding, padding), (padding, padding)),
        dimension_numbers=("NCHW", "OIHW", "NCHW"))
    inv = 1.0 / jnp.sqrt(running_var + eps)
    y = (y - running_mean[None, :, None, None]) * (gamma * inv)[None, :, None, None] \
        + beta[None, :, None, None]
    return jnp.maximum(y, 0.0)


# --------------------------------- main ------------------------------------------
if __name__ == "__main__":
    key = jax.random.PRNGKey(0)
    k_x, k_w, k_g, k_b, k_m, k_v = jax.random.split(key, 6)

    N, Cin, Cout, H, W = 2, 4, 8, 16, 16
    KH = KW = 3
    pad = 1

    x = jax.random.normal(k_x, (N, Cin, H, W), dtype=jnp.float32)
    conv_w = jax.random.normal(k_w, (Cout, Cin, KH, KW), dtype=jnp.float32) * 0.1
    gamma = jax.random.uniform(k_g, (Cout,), minval=0.5, maxval=1.5, dtype=jnp.float32)
    beta = jax.random.normal(k_b, (Cout,), dtype=jnp.float32) * 0.1
    running_mean = jax.random.normal(k_m, (Cout,), dtype=jnp.float32) * 0.1
    running_var = jax.random.uniform(k_v, (Cout,), minval=0.5, maxval=1.5, dtype=jnp.float32)

    out = basic_conv2d_forward(x, conv_w, gamma, beta, running_mean, running_var)
    out = jax.block_until_ready(out)

    ref = reference_forward(x, conv_w, gamma, beta, running_mean, running_var)
    assert out.shape == (N, Cout, H, W)
    # bf16 inputs with f32 accumulation: tolerance loosened vs the pure-f32 path.
    assert jnp.allclose(out, ref, atol=2e-2, rtol=2e-2), "mismatch vs reference"

    print("KERNEL_OK")
</pallas_src>

<mosaic_0001>
module attributes {stable_mosaic.version = 11 : i64} {
  func.func @conv_bn_relu_kernel(%arg0: i32, %arg1: memref<256x36xbf16, #tpu.memory_space<vmem>>, %arg2: memref<36x128xbf16, #tpu.memory_space<vmem>>, %arg3: memref<1x128xf32, #tpu.memory_space<vmem>>, %arg4: memref<256x128xf32, #tpu.memory_space<vmem>>) attributes {dimension_semantics = [#tpu.dimension_semantics<parallel>], iteration_bounds = array<i64: 2>, scalar_prefetch = 0 : i64, scratch_operands = 0 : i64, tpu.core_type = #tpu.core_type<tc>, window_params = [{transform_indices = @transform_0, window_bounds = array<i64: 256, 36>}, {pipeline_mode = #tpu.pipeline_mode<synchronous>, transform_indices = @transform_1, window_bounds = array<i64: 36, 128>}, {pipeline_mode = #tpu.pipeline_mode<synchronous>, transform_indices = @transform_2, window_bounds = array<i64: 1, 128>}, {transform_indices = @transform_3, window_bounds = array<i64: 256, 128>}]} {
    %c0 = arith.constant 0 : index
    %c0_0 = arith.constant 0 : index
    %0 = vector.load %arg1[%c0, %c0_0] : memref<256x36xbf16, #tpu.memory_space<vmem>>, vector<256x36xbf16>
    %c0_1 = arith.constant 0 : index
    %c0_2 = arith.constant 0 : index
    %1 = vector.load %arg2[%c0_1, %c0_2] : memref<36x128xbf16, #tpu.memory_space<vmem>>, vector<36x128xbf16>
    %cst = arith.constant dense<0.000000e+00> : vector<256x128xf32>
    %2 = tpu.matmul %0, %1, %cst {dimension_numbers = #tpu.dot_dimension_numbers<[1], [0], [0], [1], [0, 0, 1, 1], [], []>} : vector<256x36xbf16>, vector<36x128xbf16>, vector<256x128xf32> -> vector<256x128xf32>
    %c0_3 = arith.constant 0 : index
    %c0_4 = arith.constant 0 : index
    %3 = vector.load %arg3[%c0_3, %c0_4] : memref<1x128xf32, #tpu.memory_space<vmem>>, vector<1x128xf32>
    %4 = vector.broadcast %3 : vector<1x128xf32> to vector<256x128xf32>
    %5 = arith.addf %2, %4 : vector<256x128xf32>
    %cst_5 = arith.constant 0.000000e+00 : f32
    %6 = vector.broadcast %cst_5 : f32 to vector<256x128xf32>
    %7 = arith.maximumf %5, %6 : vector<256x128xf32>
    %c0_6 = arith.constant 0 : index
    %c0_7 = arith.constant 0 : index
    %8 = vector.load %arg4[%c0_6, %c0_7] : memref<256x128xf32, #tpu.memory_space<vmem>>, vector<256x128xf32>
    tpu.vector_store %arg4[%c0_6, %c0_7], %7 {strides = array<i32>} : memref<256x128xf32, #tpu.memory_space<vmem>>, vector<256x128xf32>,
    return
  }
  func.func @transform_0(%arg0: i32) -> (i32, i32) {
    %c0_i32 = arith.constant 0 : i32
    %c0_i32_0 = arith.constant 0 : i32
    return %arg0, %c0_i32 : i32, i32
  }
  func.func @transform_1(%arg0: i32) -> (i32, i32) {
    %c0_i32 = arith.constant 0 : i32
    %c0_i32_0 = arith.constant 0 : i32
    %c0_i32_1 = arith.constant 0 : i32
    return %c0_i32, %c0_i32_0 : i32, i32
  }
  func.func @transform_2(%arg0: i32) -> (i32, i32) {
    %c0_i32 = arith.constant 0 : i32
    %c0_i32_0 = arith.constant 0 : i32
    %c0_i32_1 = arith.constant 0 : i32
    return %c0_i32, %c0_i32_0 : i32, i32
  }
  func.func @transform_3(%arg0: i32) -> (i32, i32) {
    %c0_i32 = arith.constant 0 : i32
    %c0_i32_0 = arith.constant 0 : i32
    return %arg0, %c0_i32 : i32, i32
  }
}

</mosaic_0001>

<bundles_post_ra>
// kernel: tpu_custom_call.1
= control target key start
LH: loop header
LB: loop body
LE: loop exit
PB: predicated region body
PF: predicated region fallthrough
CT: control target
= control target key end

     0   :  { %8 = vsyncpa [#allocation3], 0  ;;  %s1148_s0 = inlined_call_operand.vmem [shape: bf16[512,36], index: 0, kind: input, shape index: {}]   ;;  %s1149_s1 = inlined_call_operand.vmem [shape: bf16[36,128], index: 1, kind: input, shape index: {}]   ;;  %s1150_s2 = inlined_call_operand.vmem [shape: f32[1,128], index: 2, kind: input, shape index: {}]   ;;  %s1151_s3 = inlined_call_operand.hbm [shape: f32[512,128], index: 3, kind: output, shape index: {}]  }
   0x1   :  { %10 = vsyncpa [#allocation3 + $0x1], 0  ;;  %s927_s12 = smov 0   ;;  %s929_s13 = smov 0  }
   0x2   :  { %s931_s14 = smov 0   ;;  %s933_s15 = smov 0  }
   0x3 LB: > { %s948_s16 = sadd.s32 4294967295, %s902_s15   ;;  %s666_s17 = sadd.s32 4294967294, %s902_s15   ;;  %s902_s15 = sphi %s933_s15, %s1157_s15   ;;  %s898_s14 = sphi %s931_s14, %s1156_s14   ;;  %s894_s13 = sphi %s929_s13, %s1155_s13   ;;  %s890_s12 = sphi %s927_s12, %s1154_s12  }
   0x4   : > { %s952_s18 = sadd.s32 1, %s902_s15   ;;  %s91_s19 = sadd.s32 1, %s898_s14 }
   0x5   : > { %s88_s20 = ssub.s32 %s902_s15, %s952_s18  ;;  %p101_p0 = scmp.ne.s32.totalorder %s898_s14, %s894_s13 }
   0x6   : > { %p89_p1 = scmp.eq.s32.totalorder %s88_s20, 0  ;;  %p102_p2 = scmp.eq.s32.totalorder %s948_s16, 1 }
   0x7   : > { %p107_p3 = scmp.ne.s32.totalorder %s894_s13, %s890_s12  ;;  %p108_p4 = scmp.eq.s32.totalorder %s666_s17, 1 }
   0x8   : > { %s963_s21 = scalar_select %p89_p1, %s898_s14, %s91_s19  }
   0x9   : > { %p965_p5 = por %p102_p2, %p101_p0  ;;  %p969_p6 = por %p108_p4, %p107_p3 }
   0xa   : > { %p669_p7 = scmp.ge.s32.totalorder %s902_s15, 1  ;;  %p141_p8 = scmp.lt.s32.totalorder %s902_s15, 3 }
   0xc   : > { %p142_p9 = pnand %p669_p7, %p141_p8 }
   0xd   : > { %v821_v0 = vld [vmem:[%s1149_s1] sm:$0xff] (!%p142_p9)   ;;  %v822_v1 = vld [vmem:[%s1149_s1 + $0x8] sm:$0xff] (!%p142_p9)   ;;  %s671_s28 = sshll.u32 (!%p142_p9), %s948_s16, 5  ;;  %v823_v2 = vld [vmem:[%s1149_s1 + $0x10] ss:$0 sps:$4 sm:$0x33] (!%p142_p9)  }
   0xe   : > { %145 = sbr.rel (%p142_p9) target bundleno = 285 (0x11d), region = 32  ;;  %734 = vmatprep.subr.bf16.mxu0 (!%p142_p9), %v821_v0  ;;  %772 = vmatprep.subr.bf16.mxu1 (!%p142_p9), %v821_v0  ;;  %p166_p10 = scmp.lt.s32.totalorder (!%p142_p9), %s671_s28, 63  ;;  %vm361_vm0 = vcmask (!%p142_p9), 1041408   ;;  %vm312_vm1 = vcmask (!%p142_p9), 293888   ;;  %v1026_v20 = vld [vmem:[%s1150_s2] ss:$0 sm:$0xff] (!%p142_p9) }
   0xf   : > { %735 = vmatpush3.bf16.msra.mxu0 (!%p142_p9), %v821_v0  ;;  %775 = vmatpush3.bf16.msra.mxu1 (!%p142_p9), %v821_v0  ;;  %v363_v3 = vsel (!%p142_p9), %vm361_vm0, %v823_v2, 0  ;;  %s162_s8 = sand.u32 (!%p142_p9), 1, %s894_s13   ;;  %s714_s19 = sshll.u32 (!%p142_p9), %s948_s16, 12 }
  0x10   : > { %736 = vmatprep.subr.bf16.mxu0 (!%p142_p9), %v822_v1  ;;  %773 = vmatprep.subr.bf16.mxu1 (!%p142_p9), %v822_v1  ;;  %s670_s11 = sshll.u32 (!%p142_p9), %s162_s8, 8  ;;  %s1095_s25 = scalar_lea.hbm (!%p142_p9), %s1151_s3, %s714_s19 }
  0x11   : > { %s1038_s17 = scalar_lea.vmem (!%p142_p9), [#allocation2], %s670_s11  ;;  %s1107_s26 = scalar_lea.sflag (!%p142_p9), [#allocation3], %s162_s8 }
  0x12   : > { %s604_s20 = sshll.u32 (!%p142_p9), %s1038_s17, 4  ;;  %s1097_s20 = int_to_ptr.vmem [resolvable:$true] %s604_s20 }
  0x13   : > { %737 = vmatpush3.bf16.msra.mxu0 (!%p142_p9), %v822_v1  ;;  %776 = vmatpush3.bf16.msra.mxu1 (!%p142_p9), %v822_v1  ;;  %s840_s27 = scalar_lea.vmem (!%p142_p9), %s1097_s20, 4096 }
  0x14   : > { %778 = vmatprep.subr.msk.bf16.mxu0 (!%p142_p9), %vm361_vm0, %v823_v2  ;;  %779 = vmatprep.subr.msk.bf16.mxu1 (!%p142_p9), %vm361_vm0, %v823_v2  ;;  %p841_p11 = scmp.ne.s32.totalorder (!%p142_p9), %s1097_s20, %s840_s27 }
  0x15   : > { %s1159_s28 = smov (!%p166_p10, %s671_s28), 63 }
  0x16   : > { %s672_s4 = sshll.u32 %s1159_s28, 2  ;;  %p842_p12 = pnand %p841_p11, %p965_p5 }
  0x17   : > { %s988_s7 = scalar_lea.vmem %s1148_s0, %s672_s4  ;;  %739 = vmatpush3.bf16.msra.mxu0 %v363_v3  ;;  %777 = vmatpush3.bf16.msra.mxu1 %v363_v3  ;;  %s904_s28 = smov [#allocation2]  }
  0x18   : > { %v824_v4 = vld [vmem:[%s988_s7] sm:$0xff]   ;;  %v826_v6 = vld [vmem:[%s988_s7 + $0x8] sm:$0xff]   ;;  %v828_v8 = vld [vmem:[%s988_s7 + $0x10] sm:$0xff]   ;;  %p843_p13 = pneg %p842_p12  ;;  %s844_s29 = sshll.u32 %s904_s28, 4  ;;  %s845_s29 = int_to_ptr.vmem [resolvable:$false] %s844_s29 }
  0x19   : > { %v825_v5 = vld [vmem:[%s988_s7 + $0x40] sm:$0xff]   ;;  %740 = vmatprep.mubr.msk.bf16.mxu0 %vm312_vm1, %v824_v4  ;;  %v827_v7 = vld [vmem:[%s988_s7 + $0x48] sm:$0xff]   ;;  %v829_v9 = vld [vmem:[%s988_s7 + $0x50] sm:$0xff]   ;;  %s846_s30 = scalar_lea.vmem %s845_s29, 8192  ;;  %p847_p0 = scmp.lt.s32.totalorder %s1097_s20, %s845_s29 }
  0x1a   : > { %756 = vmatprep.mubr.msk.bf16.mxu1 %vm312_vm1, %v825_v5  ;;  %741 = vmatmul.mubr.msk.bf16.vlgmr.msra.gmra.mrb[0].mxu0 %vm312_vm1, %v826_v6  ;;  %v830_v10 = vld [vmem:[%s988_s7 + $0x18] sm:$0xff]   ;;  %v832_v12 = vld [vmem:[%s988_s7 + $0x20] sm:$0xff]   ;;  %v834_v14 = vld [vmem:[%s988_s7 + $0x28] sm:$0xff]   ;;  %p848_p1 = scmp.lt.s32.totalorder %s846_s30, %s840_s27 }
  0x1b   : > { %757 = vmatmul.mubr.msk.bf16.vlgmr.msra.gmra.mrb[0].mxu1 %vm312_vm1, %v827_v7  ;;  %744 = vmatprep.mubr.msk.bf16.mxu0 %vm312_vm1, %v828_v8  ;;  %v831_v11 = vld [vmem:[%s988_s7 + $0x58] sm:$0xff]   ;;  %v833_v13 = vld [vmem:[%s988_s7 + $0x60] sm:$0xff]   ;;  %v835_v15 = vld [vmem:[%s988_s7 + $0x68] sm:$0xff]  }
  0x1c   : > { %760 = vmatprep.mubr.msk.bf16.mxu1 %vm312_vm1, %v829_v9  ;;  %v836_v16 = vld [vmem:[%s988_s7 + $0x30] sm:$0xff]   ;;  %v838_v18 = vld [vmem:[%s988_s7 + $0x38] sm:$0xff]   ;;  %p849_p2 = por %p848_p1, %p847_p0 }
  0x1d   : > { %v837_v17 = vld [vmem:[%s988_s7 + $0x70] sm:$0xff]   ;;  %v839_v19 = vld [vmem:[%s988_s7 + $0x78] sm:$0xff]  }
  0x1e   : > { %p850_p3 = pnand %p849_p2, %p843_p13 }
  0x22   : > { %745 = vmatmul.mubr.msk.bf16.gmra.mrb[4].mxu0 %vm312_vm1, %v830_v10 }
  0x23   : > { %761 = vmatmul.mubr.msk.bf16.gmra.mrb[4].mxu1 %vm312_vm1, %v831_v11  ;;  %748 = vmatprep.mubr.msk.bf16.mxu0 %vm312_vm1, %v832_v12 }
  0x24   : > { %764 = vmatprep.mubr.msk.bf16.mxu1 %vm312_vm1, %v833_v13 }
  0x2a   : > { %749 = vmatmul.mubr.msk.bf16.gmra.mrb[8].mxu0 %vm312_vm1, %v834_v14 }
  0x2b   : > { %765 = vmatmul.mubr.msk.bf16.gmra.mrb[8].mxu1 %vm312_vm1, %v835_v15  ;;  %752 = vmatprep.mubr.msk.bf16.mxu0 %vm312_vm1, %v836_v16 }
  0x2c   : > { %768 = vmatprep.mubr.msk.bf16.mxu1 %vm312_vm1, %v837_v17 }
  0x32   : > { %753 = vmatmul.mubr.msk.bf16.gmra.mrb[12].mxu0 %vm312_vm1, %v838_v18 }
  0x33   : > { %769 = vmatmul.mubr.msk.bf16.gmra.mrb[12].mxu1 %vm312_vm1, %v839_v19 }
  0xed   : > { %v742_v21 = vpop.f32.mrb[0].mxu0 }
  0xee   : > { %v758_v22 = vpop.f32.mrb[0].mxu1  ;;  %v408_v23 = vadd.f32 %v742_v21, %v1026_v20  ;;  %v399_v25 = vpop.f32.mrb[1].mxu0 }
  0xef   : > { %v472_v24 = vadd.f32 %v758_v22, %v1026_v20  ;;  %v463_v26 = vpop.f32.mrb[1].mxu1  ;;  %v400_v27 = vadd.f32 %v1026_v20, %v399_v25  ;;  %v743_v29 = vpop.f32.mrb[2].mxu0 }
  0xf0   : > { %v464_v28 = vadd.f32 %v1026_v20, %v463_v26  ;;  %v759_v30 = vpop.f32.mrb[2].mxu1  ;;  %v528_v31 = vmax.f32 %v408_v23, 0.0  ;;  %v411_v33 = vadd.f32 %v743_v29, %v1026_v20  ;;  %v402_v35 = vpop.f32.mrb[3].mxu0 }
  0xf1   : > { %v544_v32 = vmax.f32 %v472_v24, 0.0  ;;  %v475_v34 = vadd.f32 %v759_v30, %v1026_v20  ;;  %v466_v36 = vpop.f32.mrb[3].mxu1  ;;  %v526_v37 = vmax.f32 %v400_v27, 0.0  ;;  %v403_v39 = vadd.f32 %v1026_v20, %v402_v35 }
  0xf2   : > { %v542_v38 = vmax.f32 %v464_v28, 0.0  ;;  %v467_v40 = vadd.f32 %v1026_v20, %v466_v36  ;;  %560 = vst [vmem:[%s1038_s17 + $0x10] sm:$0xff] %v528_v31  ;;  %v529_v41 = vmax.f32 %v411_v33, 0.0 }
  0xf3   : > { %576 = vst [vmem:[%s1038_s17 + $0x90] sm:$0xff] %v544_v32  ;;  %v545_v42 = vmax.f32 %v475_v34, 0.0  ;;  %558 = vst [vmem:[%s1038_s17] sm:$0xff] %v526_v37  ;;  %v527_v43 = vmax.f32 %v403_v39, 0.0 }
  0xf4   : > { %574 = vst [vmem:[%s1038_s17 + $0x80] sm:$0xff] %v542_v38  ;;  %v543_v44 = vmax.f32 %v467_v40, 0.0  ;;  %561 = vst [vmem:[%s1038_s17 + $0x18] sm:$0xff] %v529_v41 }
  0xf5   : > { %577 = vst [vmem:[%s1038_s17 + $0x98] sm:$0xff] %v545_v42  ;;  %559 = vst [vmem:[%s1038_s17 + $0x8] sm:$0xff] %v527_v43  ;;  %v746_v45 = vpop.f32.mrb[4].mxu0 }
  0xf6   : > { %575 = vst [vmem:[%s1038_s17 + $0x88] sm:$0xff] %v543_v44  ;;  %v762_v46 = vpop.f32.mrb[4].mxu1  ;;  %v424_v47 = vadd.f32 %v746_v45, %v1026_v20  ;;  %v415_v49 = vpop.f32.mrb[5].mxu0 }
  0xf7   : > { %v488_v48 = vadd.f32 %v762_v46, %v1026_v20  ;;  %v479_v50 = vpop.f32.mrb[5].mxu1  ;;  %v416_v51 = vadd.f32 %v1026_v20, %v415_v49  ;;  %v747_v53 = vpop.f32.mrb[6].mxu0 }
  0xf8   : > { %v480_v52 = vadd.f32 %v1026_v20, %v479_v50  ;;  %v763_v54 = vpop.f32.mrb[6].mxu1  ;;  %v532_v55 = vmax.f32 %v424_v47, 0.0  ;;  %v427_v57 = vadd.f32 %v747_v53, %v1026_v20  ;;  %v418_v59 = vpop.f32.mrb[7].mxu0 }
  0xf9   : > { %v548_v56 = vmax.f32 %v488_v48, 0.0  ;;  %v491_v58 = vadd.f32 %v763_v54, %v1026_v20  ;;  %v482_v60 = vpop.f32.mrb[7].mxu1  ;;  %v530_v61 = vmax.f32 %v416_v51, 0.0  ;;  %v419_v63 = vadd.f32 %v1026_v20, %v418_v59 }
  0xfa   : > { %v546_v62 = vmax.f32 %v480_v52, 0.0  ;;  %v483_v0 = vadd.f32 %v1026_v20, %v482_v60  ;;  %564 = vst [vmem:[%s1038_s17 + $0x30] sm:$0xff] %v532_v55  ;;  %v533_v1 = vmax.f32 %v427_v57, 0.0 }
  0xfb   : > { %580 = vst [vmem:[%s1038_s17 + $0xb0] sm:$0xff] %v548_v56  ;;  %v549_v2 = vmax.f32 %v491_v58, 0.0  ;;  %562 = vst [vmem:[%s1038_s17 + $0x20] sm:$0xff] %v530_v61  ;;  %v531_v3 = vmax.f32 %v419_v63, 0.0 }
  0xfc   : > { %578 = vst [vmem:[%s1038_s17 + $0xa0] sm:$0xff] %v546_v62  ;;  %v547_v4 = vmax.f32 %v483_v0, 0.0  ;;  %565 = vst [vmem:[%s1038_s17 + $0x38] sm:$0xff] %v533_v1 }
  0xfd   : > { %581 = vst [vmem:[%s1038_s17 + $0xb8] sm:$0xff] %v549_v2  ;;  %563 = vst [vmem:[%s1038_s17 + $0x28] sm:$0xff] %v531_v3  ;;  %v750_v5 = vpop.f32.mrb[8].mxu0 }
  0xfe   : > { %579 = vst [vmem:[%s1038_s17 + $0xa8] sm:$0xff] %v547_v4  ;;  %v766_v6 = vpop.f32.mrb[8].mxu1  ;;  %v440_v7 = vadd.f32 %v750_v5, %v1026_v20  ;;  %v431_v9 = vpop.f32.mrb[9].mxu0 }
  0xff   : > { %v504_v8 = vadd.f32 %v766_v6, %v1026_v20  ;;  %v495_v10 = vpop.f32.mrb[9].mxu1  ;;  %v432_v11 = vadd.f32 %v1026_v20, %v431_v9  ;;  %v751_v13 = vpop.f32.mrb[10].mxu0 }
 0x100   : > { %v496_v12 = vadd.f32 %v1026_v20, %v495_v10  ;;  %v767_v14 = vpop.f32.mrb[10].mxu1  ;;  %v536_v15 = vmax.f32 %v440_v7, 0.0  ;;  %v443_v17 = vadd.f32 %v751_v13, %v1026_v20  ;;  %v434_v19 = vpop.f32.mrb[11].mxu0 }
 0x101   : > { %v552_v16 = vmax.f32 %v504_v8, 0.0  ;;  %v507_v18 = vadd.f32 %v767_v14, %v1026_v20  ;;  %v498_v21 = vpop.f32.mrb[11].mxu1  ;;  %v534_v22 = vmax.f32 %v432_v11, 0.0  ;;  %v435_v24 = vadd.f32 %v1026_v20, %v434_v19 }
 0x102   : > { %v550_v23 = vmax.f32 %v496_v12, 0.0  ;;  %v499_v25 = vadd.f32 %v1026_v20, %v498_v21  ;;  %568 = vst [vmem:[%s1038_s17 + $0x50] sm:$0xff] %v536_v15  ;;  %v537_v26 = vmax.f32 %v443_v17, 0.0 }
 0x103   : > { %584 = vst [vmem:[%s1038_s17 + $0xd0] sm:$0xff] %v552_v16  ;;  %v553_v27 = vmax.f32 %v507_v18, 0.0  ;;  %566 = vst [vmem:[%s1038_s17 + $0x40] sm:$0xff] %v534_v22  ;;  %v535_v28 = vmax.f32 %v435_v24, 0.0 }
 0x104   : > { %582 = vst [vmem:[%s1038_s17 + $0xc0] sm:$0xff] %v550_v23  ;;  %v551_v29 = vmax.f32 %v499_v25, 0.0  ;;  %569 = vst [vmem:[%s1038_s17 + $0x58] sm:$0xff] %v537_v26 }
 0x105   : > { %585 = vst [vmem:[%s1038_s17 + $0xd8] sm:$0xff] %v553_v27  ;;  %567 = vst [vmem:[%s1038_s17 + $0x48] sm:$0xff] %v535_v28  ;;  %v754_v30 = vpop.f32.mrb[12].mxu0 }
 0x106   : > { %583 = vst [vmem:[%s1038_s17 + $0xc8] sm:$0xff] %v551_v29  ;;  %v770_v31 = vpop.f32.mrb[12].mxu1  ;;  %v456_v32 = vadd.f32 %v754_v30, %v1026_v20  ;;  %v447_v34 = vpop.f32.mrb[13].mxu0 }
 0x107   : > { %v520_v33 = vadd.f32 %v770_v31, %v1026_v20  ;;  %v511_v35 = vpop.f32.mrb[13].mxu1  ;;  %v448_v36 = vadd.f32 %v1026_v20, %v447_v34  ;;  %v755_v38 = vpop.f32.mrb[14].mxu0 }
 0x108   : > { %v512_v37 = vadd.f32 %v1026_v20, %v511_v35  ;;  %v771_v39 = vpop.f32.mrb[14].mxu1  ;;  %v540_v40 = vmax.f32 %v456_v32, 0.0  ;;  %v459_v42 = vadd.f32 %v755_v38, %v1026_v20  ;;  %v450_v44 = vpop.f32.mrb[15].mxu0 }
 0x109   : > { %v556_v41 = vmax.f32 %v520_v33, 0.0  ;;  %v523_v43 = vadd.f32 %v771_v39, %v1026_v20  ;;  %v514_v45 = vpop.f32.mrb[15].mxu1  ;;  %v538_v46 = vmax.f32 %v448_v36, 0.0  ;;  %v451_v48 = vadd.f32 %v1026_v20, %v450_v44 }
 0x10a   : > { %v554_v47 = vmax.f32 %v512_v37, 0.0  ;;  %v515_v49 = vadd.f32 %v1026_v20, %v514_v45  ;;  %572 = vst [vmem:[%s1038_s17 + $0x70] sm:$0xff] %v540_v40  ;;  %v541_v50 = vmax.f32 %v459_v42, 0.0 }
 0x10b   : > { %588 = vst [vmem:[%s1038_s17 + $0xf0] sm:$0xff] %v556_v41  ;;  %v557_v51 = vmax.f32 %v523_v43, 0.0  ;;  %570 = vst [vmem:[%s1038_s17 + $0x60] sm:$0xff] %v538_v46  ;;  %v539_v52 = vmax.f32 %v451_v48, 0.0 }
 0x10c   : > { %586 = vst [vmem:[%s1038_s17 + $0xe0] sm:$0xff] %v554_v47  ;;  %v555_v53 = vmax.f32 %v515_v49, 0.0  ;;  %573 = vst [vmem:[%s1038_s17 + $0x78] sm:$0xff] %v541_v50 }
 0x10d   : > { %589 = vst [vmem:[%s1038_s17 + $0xf8] sm:$0xff] %v557_v51  ;;  %571 = vst [vmem:[%s1038_s17 + $0x68] sm:$0xff] %v539_v52 }
 0x10e   : > { %587 = vst [vmem:[%s1038_s17 + $0xe8] sm:$0xff] %v555_v53 }
 0x10f   : > { %853 = shalt.err (!%p850_p3)
}
 0x110   : > { %s854_s4 = scalar_lea.hbm %s1095_s25, 4096  ;;  %s858_s7 = scalar_lea.hbm %s1151_s3, 8192 }
 0x111   : > { %p855_p4 = scmp.ne.s32.totalorder %s1095_s25, %s854_s4  ;;  %p859_p9 = scmp.lt.u32.totalorder %s1095_s25, %s1151_s3 }
 0x112   : > { %p860_p10 = scmp.lt.u32.totalorder %s858_s7, %s854_s4  ;;  %p862_p12 = scmp.lt.u32.totalorder %s854_s4, %s1095_s25 }
 0x113   : > { %p856_p7 = pnand %p855_p4, %p965_p5 }
 0x114   : > { %p861_p11 = por %p860_p10, %p859_p9 }
 0x115   : > { %p857_p8 = pneg %p856_p7 }
 0x116   : > { %p863_p13 = por %p862_p12, %p861_p11 }
 0x118   : > { %p864_p0 = pnand %p863_p13, %p857_p8 }
 0x11a   : > { %867 = shalt.err (!%p864_p0)
}
 0x11b   : > { %s905_s10 = smov 128   ;;  %s906_s11 = smov 8  }
 0x11c   : > { %780 = dma.vmem_to_hbm [thread:$0]  (%p965_p5), %s1097_s20, 4096, %s1095_s25, %s1107_s26, %s905_s10, %s905_s10, %s906_s11  }
 0x11d PF: > { %p786_p1 = scmp.ge.s32.totalorder %s902_s15, 2  ;;  %s619_s17 = sand.u32 1, %s890_s12  }
 0x11e   : > { %s620_s19 = scalar_lea.sflag [#allocation3], %s619_s17 }
 0x11f   : > { %p783_p2 = pnand %p786_p1, %p969_p6 }
 0x121   : > { %885 = dma.done.wait (!%p783_p2), %s620_s19, 4096  }
 0x122   : > { %887 = vsyncadd (!%p783_p2), %s620_s19, 4294963200  ;;  %p13_p3 = scmp.ge.s32.totalorder %s952_s18, 4   ;;  %s1154_s12 = smov %s894_s13 }
 0x123   : > { %s1155_s13 = smov %s898_s14  ;;  %s1156_s14 = smov %s963_s21 }
 0x124   : > { %s1157_s15 = smov %s952_s18  ;;  %15 = sbr.rel (!%p13_p3) target bundleno = 3 (0x3), region = 67 }
 0x12b   :  { %625 = vsyncpa [#allocation3], 1 }
 0x12c   :  { %627 = vsyncpa [#allocation3 + $0x1], 1 }

</bundles_post_ra>
